<compile_context>
chip_gen: v7x
topology: tpu7x:2x2x1
jax: 0.10.0
libtpu: 0.0.40
codegen_flags: <defaults>
</compile_context>

<pallas_src>
import jax
import jax.numpy as jnp
from jax.experimental import pallas as pl
from jax.experimental.pallas import tpu as pltpu

BN_EPS = 1e-5


def kan_kernel(x_ref, w1_ref, b1_ref, w2_ref, b2_ref, w3t_ref, b3_ref, o_ref):
    f32 = jnp.float32

    # block 1: Linear -> ReLU          (BN1 already folded into W2'/b2')
    h = jnp.dot(x_ref[...], w1_ref[...], preferred_element_type=f32) + b1_ref[...]
    h = jnp.maximum(h, 0.0)

    # block 2: Linear(folded BN1) -> ReLU   (BN2 folded into W3'/b3')
    h = jnp.dot(h.astype(w2_ref.dtype), w2_ref[...],
                preferred_element_type=f32) + b2_ref[...]
    h = jnp.maximum(h, 0.0)

    # head: Linear(folded BN2) -> Sigmoid, computed lane-dense:
    #   w3t [1, H]  (x)  h [TB, H]  contracted on H  ->  logits [1, TB]
    # (trans-B dot_general, same form as q @ k^T in attention kernels), so the
    # bias add, sigmoid and the store all use dense 128-lane vregs instead of
    # a 1-lane-wide [TB, 1] column.
    logits = jax.lax.dot_general(
        w3t_ref[...], h.astype(w3t_ref.dtype),
        dimension_numbers=(((1,), (1,)), ((), ())),
        preferred_element_type=f32) + b3_ref[...]
    o_ref[...] = jax.nn.sigmoid(logits)                              # [1, TB]


def fold_bn_into_linear(p):
    """Eval-mode only: fold BN running stats + affine into the next Linear."""
    hi = jax.lax.Precision.HIGHEST
    s1 = p["g1"] * jax.lax.rsqrt(p["v1"] + BN_EPS)        # [1, H]
    t1 = p["be1"] - p["m1"] * s1
    s2 = p["g2"] * jax.lax.rsqrt(p["v2"] + BN_EPS)
    t2 = p["be2"] - p["m2"] * s2
    w2f = p["w2"] * s1.T                                  # scale rows of W2
    b2f = p["b2"] + jnp.dot(t1, p["w2"], precision=hi)
    w3f = p["w3"] * s2.T
    b3f = p["b3"] + jnp.dot(t2, p["w3"], precision=hi)
    return p["w1"], p["b1"], w2f, b2f, w3f, b3f


def _choose_tile_b(B, D, itemsize):
    # Small/medium batch: a single grid step (the op is launch-overhead bound,
    # and a [B, D] block of a few MiB fits easily in VMEM on all generations).
    if B <= 8192:
        return B
    # Large batch: fixed tiles (multiple of 128 lanes / 16 sublanes) so the
    # grid has >= 2 steps -> the "parallel" batch axis splits across v7x's two
    # TensorCores, and double-buffered blocks stay well under the (v7x-small)
    # VMEM budget.
    tile = ((8 << 20) // (D * itemsize) // 128) * 128
    return int(max(1024, min(8192, tile)))


def kan_forward(x, params, *, stream_dtype=jnp.bfloat16):
    """x: [B, input_dim] float32.  params: dict (see init_kan_params)."""
    B, D = x.shape
    w1, b1, w2f, b2f, w3f, b3f = fold_bn_into_linear(params)
    H = w1.shape[1]

    # Streamed operands (x + weight matrices) in stream_dtype; biases stay f32.
    xs = x.astype(stream_dtype)
    w1s = w1.astype(stream_dtype)
    w2s = w2f.astype(stream_dtype)
    w3ts = w3f.T.astype(stream_dtype)          # [1, H], used trans-B in-kernel
    b3s = b3f.reshape(1, 1)                    # scalar head bias

    tile_b = _choose_tile_b(B, D, jnp.dtype(stream_dtype).itemsize)
    grid = (pl.cdiv(B, tile_b),)               # partial tail block, no jnp.pad

    weights = (w1s, b1, w2s, b2f, w3ts, b3s)   # all tiny, VMEM-resident

    def const_spec(a):
        # full-array block, constant index_map -> DMA'd once, stays in VMEM
        return pl.BlockSpec(a.shape, lambda i: (0, 0))

    flops = 2 * B * (D * H + H * H + H)
    bytes_accessed = (int(xs.size) * xs.dtype.itemsize + B * 4
                      + sum(int(w.size) * w.dtype.itemsize for w in weights))

    out = pl.pallas_call(
        kan_kernel,
        out_shape=jax.ShapeDtypeStruct((1, B), jnp.float32),   # lane-dense row
        grid=grid,
        in_specs=[pl.BlockSpec((tile_b, D), lambda i: (i, 0))]
                 + [const_spec(w) for w in weights],
        out_specs=pl.BlockSpec((1, tile_b), lambda i: (0, i)),
        compiler_params=pltpu.CompilerParams(
            dimension_semantics=("parallel",)),
        cost_estimate=pl.CostEstimate(
            flops=flops, transcendentals=B, bytes_accessed=bytes_accessed),
    )(xs, *weights)
    return out.reshape(B, 1)


def init_kan_params(key, input_dim=64, hidden_dim=64):
    """Deterministic synthetic init matching the PyTorch module's shapes.
    Linear weights ~ U(-1/sqrt(fan_in), 1/sqrt(fan_in)); BN running stats and
    affine params are small perturbations around torch defaults."""
    ks = jax.random.split(key, 14)

    def lin(kw, kb, fan_in, fan_out):
        bound = 1.0 / jnp.sqrt(fan_in)
        w = jax.random.uniform(kw, (fan_in, fan_out), jnp.float32, -bound, bound)
        b = jax.random.uniform(kb, (1, fan_out), jnp.float32, -bound, bound)
        return w, b

    w1, b1 = lin(ks[0], ks[1], input_dim, hidden_dim)
    w2, b2 = lin(ks[2], ks[3], hidden_dim, hidden_dim)
    w3, b3 = lin(ks[4], ks[5], hidden_dim, 1)

    def bn(kg, kb, km, kv, h):
        g = 1.0 + 0.1 * jax.random.normal(kg, (1, h), jnp.float32)
        be = 0.1 * jax.random.normal(kb, (1, h), jnp.float32)
        m = 0.1 * jax.random.normal(km, (1, h), jnp.float32)
        v = jax.random.uniform(kv, (1, h), jnp.float32, 0.5, 1.5)
        return g, be, m, v

    g1, be1, m1, v1 = bn(ks[6], ks[7], ks[8], ks[9], hidden_dim)
    g2, be2, m2, v2 = bn(ks[10], ks[11], ks[12], ks[13], hidden_dim)

    return dict(w1=w1, b1=b1, g1=g1, be1=be1, m1=m1, v1=v1,
                w2=w2, b2=b2, g2=g2, be2=be2, m2=m2, v2=v2,
                w3=w3, b3=b3)


def kan_reference(x, p):
    """Pure-JAX reference (un-folded eval-mode semantics)."""
    h = jnp.maximum(x @ p["w1"] + p["b1"], 0.0)
    h = (h - p["m1"]) * (p["g1"] / jnp.sqrt(p["v1"] + BN_EPS)) + p["be1"]
    h = jnp.maximum(h @ p["w2"] + p["b2"], 0.0)
    h = (h - p["m2"]) * (p["g2"] / jnp.sqrt(p["v2"] + BN_EPS)) + p["be2"]
    return jax.nn.sigmoid(h @ p["w3"] + p["b3"])


if __name__ == "__main__":
    key = jax.random.PRNGKey(0)
    k_x, k_p = jax.random.split(key)

    B, INPUT_DIM, HIDDEN_DIM = 512, 64, 64          # module defaults; grid=(1,)
    x = jax.random.normal(k_x, (B, INPUT_DIM), jnp.float32)
    params = init_kan_params(k_p, input_dim=INPUT_DIM, hidden_dim=HIDDEN_DIM)

    ref = kan_reference(x, params)

    # Exactness check: f32 streaming path matches the un-folded reference.
    out_f32 = jax.block_until_ready(kan_forward(x, params, stream_dtype=jnp.float32))
    assert out_f32.shape == (B, 1)
    assert jnp.allclose(out_f32, ref, atol=1e-5, rtol=1e-5)

    # Fast path: bf16 streaming (default) — looser tolerance from bf16 rounding.
    out = jax.block_until_ready(kan_forward(x, params))
    assert out.shape == (B, 1)
    assert jnp.allclose(out, ref, atol=2e-2, rtol=0.0), float(jnp.max(jnp.abs(out - ref)))

    print("KERNEL_OK")
</pallas_src>

<mosaic_0001>
module attributes {stable_mosaic.version = 11 : i64} {
  func.func @kan_kernel(%arg0: i32, %arg1: memref<512x64xf32, #tpu.memory_space<vmem>>, %arg2: memref<64x64xf32, #tpu.memory_space<vmem>>, %arg3: memref<1x64xf32, #tpu.memory_space<vmem>>, %arg4: memref<64x64xf32, #tpu.memory_space<vmem>>, %arg5: memref<1x64xf32, #tpu.memory_space<vmem>>, %arg6: memref<1x64xf32, #tpu.memory_space<vmem>>, %arg7: memref<1x1xf32, #tpu.memory_space<vmem>>, %arg8: memref<1x512xf32, #tpu.memory_space<vmem>>) attributes {dimension_semantics = [#tpu.dimension_semantics<parallel>], iteration_bounds = array<i64: 1>, scalar_prefetch = 0 : i64, scratch_operands = 0 : i64, tpu.core_type = #tpu.core_type<tc>, window_params = [{transform_indices = @transform_0, window_bounds = array<i64: 512, 64>}, {pipeline_mode = #tpu.pipeline_mode<synchronous>, transform_indices = @transform_1, window_bounds = array<i64: 64, 64>}, {pipeline_mode = #tpu.pipeline_mode<synchronous>, transform_indices = @transform_2, window_bounds = array<i64: 1, 64>}, {pipeline_mode = #tpu.pipeline_mode<synchronous>, transform_indices = @transform_3, window_bounds = array<i64: 64, 64>}, {pipeline_mode = #tpu.pipeline_mode<synchronous>, transform_indices = @transform_4, window_bounds = array<i64: 1, 64>}, {pipeline_mode = #tpu.pipeline_mode<synchronous>, transform_indices = @transform_5, window_bounds = array<i64: 1, 64>}, {pipeline_mode = #tpu.pipeline_mode<synchronous>, transform_indices = @transform_6, window_bounds = array<i64: 1, 1>}, {transform_indices = @transform_7, window_bounds = array<i64: 1, 512>}]} {
    %c0 = arith.constant 0 : index
    %c0_0 = arith.constant 0 : index
    %0 = vector.load %arg1[%c0, %c0_0] : memref<512x64xf32, #tpu.memory_space<vmem>>, vector<512x64xf32>
    %c0_1 = arith.constant 0 : index
    %c0_2 = arith.constant 0 : index
    %1 = vector.load %arg2[%c0_1, %c0_2] : memref<64x64xf32, #tpu.memory_space<vmem>>, vector<64x64xf32>
    %cst = arith.constant dense<0.000000e+00> : vector<512x64xf32>
    %2 = tpu.matmul %0, %1, %cst {dimension_numbers = #tpu.dot_dimension_numbers<[1], [0], [0], [1], [0, 0, 1, 1], [], []>} : vector<512x64xf32>, vector<64x64xf32>, vector<512x64xf32> -> vector<512x64xf32>
    %c0_3 = arith.constant 0 : index
    %c0_4 = arith.constant 0 : index
    %3 = vector.load %arg3[%c0_3, %c0_4] : memref<1x64xf32, #tpu.memory_space<vmem>>, vector<1x64xf32>
    %4 = vector.broadcast %3 : vector<1x64xf32> to vector<512x64xf32>
    %5 = arith.addf %2, %4 : vector<512x64xf32>
    %cst_5 = arith.constant 0.000000e+00 : f32
    %6 = vector.broadcast %cst_5 : f32 to vector<512x64xf32>
    %7 = arith.maximumf %5, %6 : vector<512x64xf32>
    %c0_6 = arith.constant 0 : index
    %c0_7 = arith.constant 0 : index
    %8 = vector.load %arg4[%c0_6, %c0_7] : memref<64x64xf32, #tpu.memory_space<vmem>>, vector<64x64xf32>
    %cst_8 = arith.constant dense<0.000000e+00> : vector<512x64xf32>
    %9 = tpu.matmul %7, %8, %cst_8 {dimension_numbers = #tpu.dot_dimension_numbers<[1], [0], [0], [1], [0, 0, 1, 1], [], []>} : vector<512x64xf32>, vector<64x64xf32>, vector<512x64xf32> -> vector<512x64xf32>
    %c0_9 = arith.constant 0 : index
    %c0_10 = arith.constant 0 : index
    %10 = vector.load %arg5[%c0_9, %c0_10] : memref<1x64xf32, #tpu.memory_space<vmem>>, vector<1x64xf32>
    %11 = vector.broadcast %10 : vector<1x64xf32> to vector<512x64xf32>
    %12 = arith.addf %9, %11 : vector<512x64xf32>
    %cst_11 = arith.constant 0.000000e+00 : f32
    %13 = vector.broadcast %cst_11 : f32 to vector<512x64xf32>
    %14 = arith.maximumf %12, %13 : vector<512x64xf32>
    %c0_12 = arith.constant 0 : index
    %c0_13 = arith.constant 0 : index
    %15 = vector.load %arg6[%c0_12, %c0_13] : memref<1x64xf32, #tpu.memory_space<vmem>>, vector<1x64xf32>
    %cst_14 = arith.constant dense<0.000000e+00> : vector<1x512xf32>
    %16 = tpu.matmul %15, %14, %cst_14 {dimension_numbers = #tpu.dot_dimension_numbers<[1], [1], [0], [0], [0, 0, 1, 0], [], []>} : vector<1x64xf32>, vector<512x64xf32>, vector<1x512xf32> -> vector<1x512xf32>
    %c0_15 = arith.constant 0 : index
    %c0_16 = arith.constant 0 : index
    %17 = vector.load %arg7[%c0_15, %c0_16] : memref<1x1xf32, #tpu.memory_space<vmem>>, vector<1x1xf32>
    %18 = vector.broadcast %17 : vector<1x1xf32> to vector<1x512xf32>
    %19 = arith.addf %16, %18 : vector<1x512xf32>
    %20 = arith.negf %19 : vector<1x512xf32>
    %21 = math.exp %20 : vector<1x512xf32>
    %cst_17 = arith.constant 1.000000e+00 : f32
    %22 = vector.broadcast %cst_17 : f32 to vector<1x512xf32>
    %23 = arith.addf %22, %21 : vector<1x512xf32>
    %24 = arith.divf %22, %23 : vector<1x512xf32>
    %c0_18 = arith.constant 0 : index
    %c0_19 = arith.constant 0 : index
    %25 = vector.load %arg8[%c0_18, %c0_19] : memref<1x512xf32, #tpu.memory_space<vmem>>, vector<1x512xf32>
    tpu.vector_store %arg8[%c0_18, %c0_19], %24 {strides = array<i32>} : memref<1x512xf32, #tpu.memory_space<vmem>>, vector<1x512xf32>,
    return
  }
  func.func @transform_0(%arg0: i32) -> (i32, i32) {
    %c0_i32 = arith.constant 0 : i32
    %c0_i32_0 = arith.constant 0 : i32
    return %arg0, %c0_i32 : i32, i32
  }
  func.func @transform_1(%arg0: i32) -> (i32, i32) {
    %c0_i32 = arith.constant 0 : i32
    %c0_i32_0 = arith.constant 0 : i32
    %c0_i32_1 = arith.constant 0 : i32
    return %c0_i32, %c0_i32_0 : i32, i32
  }
  func.func @transform_2(%arg0: i32) -> (i32, i32) {
    %c0_i32 = arith.constant 0 : i32
    %c0_i32_0 = arith.constant 0 : i32
    %c0_i32_1 = arith.constant 0 : i32
    return %c0_i32, %c0_i32_0 : i32, i32
  }
  func.func @transform_3(%arg0: i32) -> (i32, i32) {
    %c0_i32 = arith.constant 0 : i32
    %c0_i32_0 = arith.constant 0 : i32
    %c0_i32_1 = arith.constant 0 : i32
    return %c0_i32, %c0_i32_0 : i32, i32
  }
  func.func @transform_4(%arg0: i32) -> (i32, i32) {
    %c0_i32 = arith.constant 0 : i32
    %c0_i32_0 = arith.constant 0 : i32
    %c0_i32_1 = arith.constant 0 : i32
    return %c0_i32, %c0_i32_0 : i32, i32
  }
  func.func @transform_5(%arg0: i32) -> (i32, i32) {
    %c0_i32 = arith.constant 0 : i32
    %c0_i32_0 = arith.constant 0 : i32
    %c0_i32_1 = arith.constant 0 : i32
    return %c0_i32, %c0_i32_0 : i32, i32
  }
  func.func @transform_6(%arg0: i32) -> (i32, i32) {
    %c0_i32 = arith.constant 0 : i32
    %c0_i32_0 = arith.constant 0 : i32
    %c0_i32_1 = arith.constant 0 : i32
    return %c0_i32, %c0_i32_0 : i32, i32
  }
  func.func @transform_7(%arg0: i32) -> (i32, i32) {
    %c0_i32 = arith.constant 0 : i32
    %c0_i32_0 = arith.constant 0 : i32
    return %c0_i32, %arg0 : i32, i32
  }
}

</mosaic_0001>

<bundles_post_ra>
// kernel: tpu_custom_call.1
= control target key start
LH: loop header
LB: loop body
LE: loop exit
PB: predicated region body
PF: predicated region fallthrough
CT: control target
= control target key end

     0   :  { %s3329_s0 = inlined_call_operand.vmem [shape: f32[512,64], index: 0, kind: input, shape index: {}]   ;;  %s3330_s1 = inlined_call_operand.vmem [shape: f32[64,64], index: 1, kind: input, shape index: {}]   ;;  %s3331_s2 = inlined_call_operand.vmem [shape: f32[1,64], index: 2, kind: input, shape index: {}]   ;;  %s3332_s3 = inlined_call_operand.vmem [shape: f32[64,64], index: 3, kind: input, shape index: {}]   ;;  %s3333_s4 = inlined_call_operand.vmem [shape: f32[1,64], index: 4, kind: input, shape index: {}]   ;;  %s3334_s5 = inlined_call_operand.vmem [shape: f32[1,64], index: 5, kind: input, shape index: {}]   ;;  %s3335_s6 = inlined_call_operand.<no memory space> [shape: f32[1,1], index: 6, kind: input, shape index: {}]   ;;  %s3336_s7 = inlined_call_operand.hbm [shape: f32[1,512], index: 7, kind: output, shape index: {}]  }
   0x1   :  { %v12_v0 = vstv %s3335_s6 }
   0x2   :  { %13 = vst [vmem:[#allocation2] sm:$0x1] %v12_v0 }
   0x3   :  { %v93_v1 = vld [vmem:[%s3330_s1] sm:$0xff]  ;;  %v94_v2 = vld [vmem:[%s3330_s1 + $0x8] sm:$0xff]  ;;  %v95_v3 = vld [vmem:[%s3330_s1 + $0x10] sm:$0xff]  ;;  %vm108_vm0 = vcmask 523264  }
   0x4   :  { %v2462_v4 = vpack.c.bf16 %v94_v2, %v93_v1  ;;  %v96_v5 = vld [vmem:[%s3330_s1 + $0x18] sm:$0xff]  ;;  %v97_v7 = vld [vmem:[%s3330_s1 + $0x20] sm:$0xff]  ;;  %v98_v8 = vld [vmem:[%s3330_s1 + $0x28] sm:$0xff] }
   0x5   :  { %v2466_v6 = vpack.c.bf16 %v96_v5, %v95_v3  ;;  %v29_v9 = vld [vmem:[%s3329_s0] sm:$0xff]  ;;  %v2470_v10 = vpack.c.bf16 %v98_v8, %v97_v7  ;;  %v99_v11 = vld [vmem:[%s3330_s1 + $0x30] sm:$0xff]  ;;  %v100_v12 = vld [vmem:[%s3330_s1 + $0x38] sm:$0xff] }
   0x6   :  { %2463 = vmatprep.subr.bf16.mxu0 %v2462_v4  ;;  %2254 = vmatprep.mubr.msk.f32.mxu0 %vm108_vm0, %v29_v9  ;;  %v2474_v13 = vpack.c.bf16 %v100_v12, %v99_v11  ;;  %v30_v14 = vld [vmem:[%s3329_s0 + $0x8] sm:$0xff]  ;;  %v31_v15 = vld [vmem:[%s3329_s0 + $0x10] sm:$0xff]  ;;  %v32_v16 = vld [vmem:[%s3329_s0 + $0x18] sm:$0xff] }
   0x7   :  { %2465 = vmatpush3.bf16.msra.mxu0 %v2462_v4  ;;  %v33_v17 = vld [vmem:[%s3329_s0 + $0x20] sm:$0xff]  ;;  %v34_v18 = vld [vmem:[%s3329_s0 + $0x28] sm:$0xff]  ;;  %v752_v21 = vld [vmem:[%s3332_s3 + $0x10] sm:$0xff] }
   0x8   :  { %2467 = vmatprep.subr.bf16.mxu0 %v2466_v6  ;;  %v750_v19 = vld [vmem:[%s3332_s3] sm:$0xff]  ;;  %v751_v20 = vld [vmem:[%s3332_s3 + $0x8] sm:$0xff]  ;;  %v35_v22 = vld [vmem:[%s3329_s0 + $0x30] sm:$0xff] }
   0x9   :  { %v2478_v23 = vpack.c.bf16 %v751_v20, %v750_v19  ;;  %v753_v24 = vld [vmem:[%s3332_s3 + $0x18] sm:$0xff]  ;;  %v754_v26 = vld [vmem:[%s3332_s3 + $0x20] sm:$0xff]  ;;  %v755_v27 = vld [vmem:[%s3332_s3 + $0x28] sm:$0xff] }
   0xa   :  { %v2482_v25 = vpack.c.bf16 %v753_v24, %v752_v21 }
   0xb   :  { %2469 = vmatpush3.bf16.msra.mxu0 %v2466_v6 }
   0xc   :  { %2471 = vmatprep.subr.bf16.mxu0 %v2470_v10 }
   0xf   :  { %2473 = vmatpush3.bf16.msra.mxu0 %v2470_v10 }
  0x10   :  { %2475 = vmatprep.subr.bf16.mxu0 %v2474_v13 }
  0x13   :  { %2477 = vmatpush3.bf16.msra.mxu0 %v2474_v13 }
  0x16   :  { %2255 = vmatmul.mubr.msk.f32.vlgmr.msra.gmra.mrb[0].mxu0 %vm108_vm0, %v30_v14 }
  0x17   :  { %2257 = vmatprep.mubr.msk.f32.mxu0 %vm108_vm0, %v31_v15 }
  0x1a   :  { %2258 = vmatmul.mubr.msk.f32.gmra.mrb[2].mxu0 %vm108_vm0, %v32_v16 }
  0x1b   :  { %2260 = vmatprep.mubr.msk.f32.mxu0 %vm108_vm0, %v33_v17 }
  0x1c   :  { %14 = vsyncpa [#allocation4], 0  ;;  %2479 = vmatprep.subr.bf16.mxu1 %v2478_v23  ;;  %v36_v28 = vld [vmem:[%s3329_s0 + $0x38] sm:$0xff]  ;;  %v37_v29 = vld [vmem:[%s3329_s0 + $0x40] sm:$0xff]  ;;  %v2486_v30 = vpack.c.bf16 %v755_v27, %v754_v26 }
  0x1d   :  { %2481 = vmatpush3.bf16.msra.mxu1 %v2478_v23  ;;  %v38_v31 = vld [vmem:[%s3329_s0 + $0x48] sm:$0xff]  ;;  %v39_v32 = vld [vmem:[%s3329_s0 + $0x50] sm:$0xff]  ;;  %v40_v33 = vld [vmem:[%s3329_s0 + $0x58] sm:$0xff] }
  0x1e   :  { %2261 = vmatmul.mubr.msk.f32.gmra.mrb[4].mxu0 %vm108_vm0, %v34_v18  ;;  %2483 = vmatprep.subr.bf16.mxu1 %v2482_v25  ;;  %v41_v34 = vld [vmem:[%s3329_s0 + $0x60] sm:$0xff]  ;;  %v42_v35 = vld [vmem:[%s3329_s0 + $0x68] sm:$0xff]  ;;  %v43_v36 = vld [vmem:[%s3329_s0 + $0x70] sm:$0xff] }
  0x1f   :  { %2263 = vmatprep.mubr.msk.f32.mxu0 %vm108_vm0, %v35_v22  ;;  %v44_v37 = vld [vmem:[%s3329_s0 + $0x78] sm:$0xff]  ;;  %v45_v38 = vld [vmem:[%s3329_s0 + $0x80] sm:$0xff]  ;;  %v46_v39 = vld [vmem:[%s3329_s0 + $0x88] sm:$0xff] }
  0x20   :  { %v47_v40 = vld [vmem:[%s3329_s0 + $0x90] sm:$0xff]  ;;  %v48_v41 = vld [vmem:[%s3329_s0 + $0x98] sm:$0xff]  ;;  %v49_v42 = vld [vmem:[%s3329_s0 + $0xa0] sm:$0xff] }
  0x21   :  { %2485 = vmatpush3.bf16.msra.mxu1 %v2482_v25  ;;  %v50_v43 = vld [vmem:[%s3329_s0 + $0xa8] sm:$0xff]  ;;  %v51_v44 = vld [vmem:[%s3329_s0 + $0xb0] sm:$0xff]  ;;  %v52_v45 = vld [vmem:[%s3329_s0 + $0xb8] sm:$0xff] }
  0x22   :  { %2264 = vmatmul.mubr.msk.f32.gmra.mrb[6].mxu0 %vm108_vm0, %v36_v28  ;;  %2487 = vmatprep.subr.bf16.mxu1 %v2486_v30  ;;  %v53_v46 = vld [vmem:[%s3329_s0 + $0xc0] sm:$0xff]  ;;  %v54_v47 = vld [vmem:[%s3329_s0 + $0xc8] sm:$0xff]  ;;  %v55_v48 = vld [vmem:[%s3329_s0 + $0xd0] sm:$0xff] }
  0x23   :  { %2266 = vmatprep.mubr.msk.f32.mxu0 %vm108_vm0, %v37_v29  ;;  %v56_v49 = vld [vmem:[%s3329_s0 + $0xd8] sm:$0xff]  ;;  %v57_v50 = vld [vmem:[%s3329_s0 + $0xe0] sm:$0xff]  ;;  %v58_v51 = vld [vmem:[%s3329_s0 + $0xe8] sm:$0xff] }
  0x24   :  { %v59_v52 = vld [vmem:[%s3329_s0 + $0xf0] sm:$0xff]  ;;  %v60_v53 = vld [vmem:[%s3329_s0 + $0xf8] sm:$0xff]  ;;  %v61_v54 = vld [vmem:[%s3329_s0 + $0x100] sm:$0xff] }
  0x25   :  { %2489 = vmatpush3.bf16.msra.mxu1 %v2486_v30  ;;  %v62_v55 = vld [vmem:[%s3329_s0 + $0x108] sm:$0xff]  ;;  %v63_v56 = vld [vmem:[%s3329_s0 + $0x110] sm:$0xff]  ;;  %v64_v57 = vld [vmem:[%s3329_s0 + $0x118] sm:$0xff] }
  0x26   :  { %2267 = vmatmul.mubr.msk.f32.gmra.mrb[8].mxu0 %vm108_vm0, %v38_v31  ;;  %v65_v58 = vld [vmem:[%s3329_s0 + $0x120] sm:$0xff]  ;;  %v66_v59 = vld [vmem:[%s3329_s0 + $0x128] sm:$0xff]  ;;  %v67_v60 = vld [vmem:[%s3329_s0 + $0x130] sm:$0xff] }
  0x27   :  { %2269 = vmatprep.mubr.msk.f32.mxu0 %vm108_vm0, %v39_v32  ;;  %v68_v61 = vld [vmem:[%s3329_s0 + $0x138] sm:$0xff]  ;;  %v69_v62 = vld [vmem:[%s3329_s0 + $0x140] sm:$0xff]  ;;  %v70_v63 = vld [vmem:[%s3329_s0 + $0x148] sm:$0xff] }
  0x28   :  { %v71_v0 = vld [vmem:[%s3329_s0 + $0x150] sm:$0xff]  ;;  %v72_v1 = vld [vmem:[%s3329_s0 + $0x158] sm:$0xff]  ;;  %v73_v2 = vld [vmem:[%s3329_s0 + $0x160] sm:$0xff] }
  0x29   :  { %v756_v3 = vld [vmem:[%s3332_s3 + $0x30] sm:$0xff]  ;;  %v757_v4 = vld [vmem:[%s3332_s3 + $0x38] sm:$0xff]  ;;  %v74_v6 = vld [vmem:[%s3329_s0 + $0x168] sm:$0xff] }
  0x2a   :  { %2270 = vmatmul.mubr.msk.f32.gmra.mrb[10].mxu0 %vm108_vm0, %v40_v33  ;;  %v2490_v5 = vpack.c.bf16 %v757_v4, %v756_v3  ;;  %v75_v7 = vld [vmem:[%s3329_s0 + $0x170] sm:$0xff]  ;;  %v76_v8 = vld [vmem:[%s3329_s0 + $0x178] sm:$0xff]  ;;  %v77_v9 = vld [vmem:[%s3329_s0 + $0x180] sm:$0xff] }
  0x2b   :  { %2272 = vmatprep.mubr.msk.f32.mxu0 %vm108_vm0, %v41_v34  ;;  %v78_v10 = vld [vmem:[%s3329_s0 + $0x188] sm:$0xff]  ;;  %v79_v11 = vld [vmem:[%s3329_s0 + $0x190] sm:$0xff]  ;;  %v80_v12 = vld [vmem:[%s3329_s0 + $0x198] sm:$0xff] }
  0x2c   :  { %2491 = vmatprep.subr.bf16.mxu1 %v2490_v5  ;;  %v81_v13 = vld [vmem:[%s3329_s0 + $0x1a0] sm:$0xff]  ;;  %v82_v14 = vld [vmem:[%s3329_s0 + $0x1a8] sm:$0xff]  ;;  %v83_v15 = vld [vmem:[%s3329_s0 + $0x1b0] sm:$0xff] }
  0x2d   :  { %2493 = vmatpush3.bf16.msra.mxu1 %v2490_v5  ;;  %v84_v16 = vld [vmem:[%s3329_s0 + $0x1b8] sm:$0xff]  ;;  %v85_v17 = vld [vmem:[%s3329_s0 + $0x1c0] sm:$0xff]  ;;  %v86_v18 = vld [vmem:[%s3329_s0 + $0x1c8] sm:$0xff] }
  0x2e   :  { %2273 = vmatmul.mubr.msk.f32.gmra.mrb[12].mxu0 %vm108_vm0, %v42_v35  ;;  %v87_v19 = vld [vmem:[%s3329_s0 + $0x1d0] sm:$0xff]  ;;  %v88_v20 = vld [vmem:[%s3329_s0 + $0x1d8] sm:$0xff]  ;;  %v89_v21 = vld [vmem:[%s3329_s0 + $0x1e0] sm:$0xff] }
  0x2f   :  { %2275 = vmatprep.mubr.msk.f32.mxu0 %vm108_vm0, %v43_v36  ;;  %v90_v22 = vld [vmem:[%s3329_s0 + $0x1e8] sm:$0xff]  ;;  %v91_v23 = vld [vmem:[%s3329_s0 + $0x1f0] sm:$0xff]  ;;  %v92_v24 = vld [vmem:[%s3329_s0 + $0x1f8] sm:$0xff] }
  0x30   :  { %v2987_v25 = vld [vmem:[%s3331_s2] ss:$0 sm:$0xff]  ;;  %vm3168_vm1 = vmpackc.low %vm108_vm0, %vm108_vm0 }
  0x32   :  { %2276 = vmatmul.mubr.msk.f32.gmra.mrb[14].mxu0 %vm108_vm0, %v44_v37 }
  0x33   :  { %2278 = vmatprep.mubr.msk.f32.mxu0 %vm108_vm0, %v45_v38 }
  0x36   :  { %2279 = vmatmul.mubr.msk.f32.gmra.mrb[16].mxu0 %vm108_vm0, %v46_v39 }
  0x37   :  { %2281 = vmatprep.mubr.msk.f32.mxu0 %vm108_vm0, %v47_v40 }
  0x3a   :  { %2282 = vmatmul.mubr.msk.f32.gmra.mrb[18].mxu0 %vm108_vm0, %v48_v41 }
  0x3b   :  { %2284 = vmatprep.mubr.msk.f32.mxu0 %vm108_vm0, %v49_v42 }
  0x3e   :  { %2285 = vmatmul.mubr.msk.f32.gmra.mrb[20].mxu0 %vm108_vm0, %v50_v43 }
  0x3f   :  { %2287 = vmatprep.mubr.msk.f32.mxu0 %vm108_vm0, %v51_v44 }
  0x42   :  { %2288 = vmatmul.mubr.msk.f32.gmra.mrb[22].mxu0 %vm108_vm0, %v52_v45 }
  0x43   :  { %2290 = vmatprep.mubr.msk.f32.mxu0 %vm108_vm0, %v53_v46 }
  0x46   :  { %2291 = vmatmul.mubr.msk.f32.gmra.mrb[24].mxu0 %vm108_vm0, %v54_v47 }
  0x47   :  { %2293 = vmatprep.mubr.msk.f32.mxu0 %vm108_vm0, %v55_v48 }
  0x4a   :  { %2294 = vmatmul.mubr.msk.f32.gmra.mrb[26].mxu0 %vm108_vm0, %v56_v49 }
  0x4b   :  { %2296 = vmatprep.mubr.msk.f32.mxu0 %vm108_vm0, %v57_v50 }
  0x4e   :  { %2297 = vmatmul.mubr.msk.f32.gmra.mrb[28].mxu0 %vm108_vm0, %v58_v51 }
  0x4f   :  { %2299 = vmatprep.mubr.msk.f32.mxu0 %vm108_vm0, %v59_v52 }
  0x52   :  { %2300 = vmatmul.mubr.msk.f32.gmra.mrb[30].mxu0 %vm108_vm0, %v60_v53 }
  0x53   :  { %2302 = vmatprep.mubr.msk.f32.mxu0 %vm108_vm0, %v61_v54 }
  0x56   :  { %2303 = vmatmul.mubr.msk.f32.gmra.mrb[32].mxu0 %vm108_vm0, %v62_v55 }
  0x57   :  { %2305 = vmatprep.mubr.msk.f32.mxu0 %vm108_vm0, %v63_v56 }
  0x5a   :  { %2306 = vmatmul.mubr.msk.f32.gmra.mrb[34].mxu0 %vm108_vm0, %v64_v57 }
  0x5b   :  { %2308 = vmatprep.mubr.msk.f32.mxu0 %vm108_vm0, %v65_v58 }
  0x5e   :  { %2309 = vmatmul.mubr.msk.f32.gmra.mrb[36].mxu0 %vm108_vm0, %v66_v59 }
  0x5f   :  { %2311 = vmatprep.mubr.msk.f32.mxu0 %vm108_vm0, %v67_v60 }
  0x62   :  { %2312 = vmatmul.mubr.msk.f32.gmra.mrb[38].mxu0 %vm108_vm0, %v68_v61 }
  0x63   :  { %2314 = vmatprep.mubr.msk.f32.mxu0 %vm108_vm0, %v69_v62 }
  0x66   :  { %2315 = vmatmul.mubr.msk.f32.gmra.mrb[40].mxu0 %vm108_vm0, %v70_v63 }
  0x67   :  { %2317 = vmatprep.mubr.msk.f32.mxu0 %vm108_vm0, %v71_v0 }
  0x6a   :  { %2318 = vmatmul.mubr.msk.f32.gmra.mrb[42].mxu0 %vm108_vm0, %v72_v1 }
  0x6b   :  { %2320 = vmatprep.mubr.msk.f32.mxu0 %vm108_vm0, %v73_v2 }
  0x6e   :  { %2321 = vmatmul.mubr.msk.f32.gmra.mrb[44].mxu0 %vm108_vm0, %v74_v6 }
  0x6f   :  { %2323 = vmatprep.mubr.msk.f32.mxu0 %vm108_vm0, %v75_v7 }
  0x72   :  { %2324 = vmatmul.mubr.msk.f32.gmra.mrb[46].mxu0 %vm108_vm0, %v76_v8 }
  0x73   :  { %2326 = vmatprep.mubr.msk.f32.mxu0 %vm108_vm0, %v77_v9 }
  0x76   :  { %2327 = vmatmul.mubr.msk.f32.gmra.mrb[48].mxu0 %vm108_vm0, %v78_v10 }
  0x77   :  { %2329 = vmatprep.mubr.msk.f32.mxu0 %vm108_vm0, %v79_v11 }
  0x7a   :  { %2330 = vmatmul.mubr.msk.f32.gmra.mrb[50].mxu0 %vm108_vm0, %v80_v12 }
  0x7b   :  { %2332 = vmatprep.mubr.msk.f32.mxu0 %vm108_vm0, %v81_v13 }
  0x7e   :  { %2333 = vmatmul.mubr.msk.f32.gmra.mrb[52].mxu0 %vm108_vm0, %v82_v14 }
  0x7f   :  { %2335 = vmatprep.mubr.msk.f32.mxu0 %vm108_vm0, %v83_v15 }
  0x82   :  { %2336 = vmatmul.mubr.msk.f32.gmra.mrb[54].mxu0 %vm108_vm0, %v84_v16 }
  0x83   :  { %2338 = vmatprep.mubr.msk.f32.mxu0 %vm108_vm0, %v85_v17 }
  0x86   :  { %2339 = vmatmul.mubr.msk.f32.gmra.mrb[56].mxu0 %vm108_vm0, %v86_v18 }
  0x87   :  { %2341 = vmatprep.mubr.msk.f32.mxu0 %vm108_vm0, %v87_v19 }
  0x8a   :  { %2342 = vmatmul.mubr.msk.f32.gmra.mrb[58].mxu0 %vm108_vm0, %v88_v20 }
  0x8b   :  { %2344 = vmatprep.mubr.msk.f32.mxu0 %vm108_vm0, %v89_v21 }
  0x8e   :  { %2345 = vmatmul.mubr.msk.f32.gmra.mrb[60].mxu0 %vm108_vm0, %v90_v22 }
  0x8f   :  { %2347 = vmatprep.mubr.msk.f32.mxu0 %vm108_vm0, %v91_v23 }
  0x92   :  { %2348 = vmatmul.mubr.msk.f32.gmra.mrb[62].mxu0 %vm108_vm0, %v92_v24 }
  0xe9   :  { %v2256_v26 = vpop.f32.mrb[0].mxu0 }
  0xea   :  { %v373_v27 = vadd.f32 %v2256_v26, %v2987_v25  ;;  %v367_v28 = vpop.f32.mrb[1].mxu0 }
  0xeb   :  { %v368_v29 = vadd.f32 %v2987_v25, %v367_v28 }
  0xec   :  { %v687_v32 = vmax.f32 %v373_v27, 0.0 }
  0xed   :  { %v686_v30 = vmax.f32 %v368_v29, 0.0  ;;  %v2259_v31 = vpop.f32.mrb[2].mxu0 }
  0xee   :  { %v383_v33 = vadd.f32 %v2259_v31, %v2987_v25  ;;  %v377_v34 = vpop.f32.mrb[3].mxu0 }
  0xef   :  { %v378_v35 = vadd.f32 %v2987_v25, %v377_v34  ;;  %2366 = vmatprep.mubr.msk.f32.mxu1 %vm108_vm0, %v686_v30 }
  0xf0   :  { %2367 = vmatmul.mubr.msk.f32.vlgmr.msra.gmra.mrb[0].mxu1 %vm108_vm0, %v687_v32  ;;  %v689_v38 = vmax.f32 %v383_v33, 0.0 }
  0xf1   :  { %v688_v36 = vmax.f32 %v378_v35, 0.0  ;;  %v2262_v37 = vpop.f32.mrb[4].mxu0 }
  0xf2   :  { %v393_v39 = vadd.f32 %v2262_v37, %v2987_v25  ;;  %v387_v40 = vpop.f32.mrb[5].mxu0 }
  0xf3   :  { %v388_v41 = vadd.f32 %v2987_v25, %v387_v40  ;;  %2369 = vmatprep.mubr.msk.f32.mxu1 %vm108_vm0, %v688_v36 }
  0xf4   :  { %2370 = vmatmul.mubr.msk.f32.gmra.mrb[2].mxu1 %vm108_vm0, %v689_v38  ;;  %v691_v44 = vmax.f32 %v393_v39, 0.0 }
  0xf5   :  { %v690_v42 = vmax.f32 %v388_v41, 0.0  ;;  %v2265_v43 = vpop.f32.mrb[6].mxu0 }
  0xf6   :  { %v403_v45 = vadd.f32 %v2265_v43, %v2987_v25  ;;  %v397_v46 = vpop.f32.mrb[7].mxu0 }
  0xf7   :  { %v398_v47 = vadd.f32 %v2987_v25, %v397_v46  ;;  %2372 = vmatprep.mubr.msk.f32.mxu1 %vm108_vm0, %v690_v42 }
  0xf8   :  { %2373 = vmatmul.mubr.msk.f32.gmra.mrb[4].mxu1 %vm108_vm0, %v691_v44  ;;  %v693_v50 = vmax.f32 %v403_v45, 0.0 }
  0xf9   :  { %v692_v48 = vmax.f32 %v398_v47, 0.0  ;;  %v2268_v49 = vpop.f32.mrb[8].mxu0 }
  0xfa   :  { %v413_v51 = vadd.f32 %v2268_v49, %v2987_v25  ;;  %v407_v52 = vpop.f32.mrb[9].mxu0 }
  0xfb   :  { %v408_v53 = vadd.f32 %v2987_v25, %v407_v52  ;;  %2375 = vmatprep.mubr.msk.f32.mxu1 %vm108_vm0, %v692_v48 }
  0xfc   :  { %2376 = vmatmul.mubr.msk.f32.gmra.mrb[6].mxu1 %vm108_vm0, %v693_v50  ;;  %v695_v56 = vmax.f32 %v413_v51, 0.0 }
  0xfd   :  { %v694_v54 = vmax.f32 %v408_v53, 0.0  ;;  %v2271_v55 = vpop.f32.mrb[10].mxu0 }
  0xfe   :  { %v423_v57 = vadd.f32 %v2271_v55, %v2987_v25  ;;  %v417_v58 = vpop.f32.mrb[11].mxu0 }
  0xff   :  { %v418_v59 = vadd.f32 %v2987_v25, %v417_v58  ;;  %2378 = vmatprep.mubr.msk.f32.mxu1 %vm108_vm0, %v694_v54 }
 0x100   :  { %2379 = vmatmul.mubr.msk.f32.gmra.mrb[8].mxu1 %vm108_vm0, %v695_v56  ;;  %v697_v62 = vmax.f32 %v423_v57, 0.0 }
 0x101   :  { %v696_v60 = vmax.f32 %v418_v59, 0.0  ;;  %v2274_v61 = vpop.f32.mrb[12].mxu0 }
 0x102   :  { %v433_v63 = vadd.f32 %v2274_v61, %v2987_v25  ;;  %v427_v0 = vpop.f32.mrb[13].mxu0 }
 0x103   :  { %v428_v1 = vadd.f32 %v2987_v25, %v427_v0  ;;  %2381 = vmatprep.mubr.msk.f32.mxu1 %vm108_vm0, %v696_v60 }
 0x104   :  { %2382 = vmatmul.mubr.msk.f32.gmra.mrb[10].mxu1 %vm108_vm0, %v697_v62  ;;  %v699_v4 = vmax.f32 %v433_v63, 0.0 }
 0x105   :  { %v698_v2 = vmax.f32 %v428_v1, 0.0  ;;  %v2277_v3 = vpop.f32.mrb[14].mxu0 }
 0x106   :  { %v443_v5 = vadd.f32 %v2277_v3, %v2987_v25  ;;  %v437_v6 = vpop.f32.mrb[15].mxu0 }
 0x107   :  { %v438_v7 = vadd.f32 %v2987_v25, %v437_v6  ;;  %2384 = vmatprep.mubr.msk.f32.mxu1 %vm108_vm0, %v698_v2 }
 0x108   :  { %2385 = vmatmul.mubr.msk.f32.gmra.mrb[12].mxu1 %vm108_vm0, %v699_v4  ;;  %v701_v10 = vmax.f32 %v443_v5, 0.0 }
 0x109   :  { %v700_v8 = vmax.f32 %v438_v7, 0.0  ;;  %v2280_v9 = vpop.f32.mrb[16].mxu0 }
 0x10a   :  { %v453_v11 = vadd.f32 %v2280_v9, %v2987_v25  ;;  %v447_v12 = vpop.f32.mrb[17].mxu0 }
 0x10b   :  { %v448_v13 = vadd.f32 %v2987_v25, %v447_v12  ;;  %2387 = vmatprep.mubr.msk.f32.mxu1 %vm108_vm0, %v700_v8 }
 0x10c   :  { %2388 = vmatmul.mubr.msk.f32.gmra.mrb[14].mxu1 %vm108_vm0, %v701_v10  ;;  %v703_v16 = vmax.f32 %v453_v11, 0.0 }
 0x10d   :  { %v702_v14 = vmax.f32 %v448_v13, 0.0  ;;  %v2283_v15 = vpop.f32.mrb[18].mxu0 }
 0x10e   :  { %v463_v17 = vadd.f32 %v2283_v15, %v2987_v25  ;;  %v457_v18 = vpop.f32.mrb[19].mxu0 }
 0x10f   :  { %v458_v19 = vadd.f32 %v2987_v25, %v457_v18  ;;  %2390 = vmatprep.mubr.msk.f32.mxu1 %vm108_vm0, %v702_v14 }
 0x110   :  { %2391 = vmatmul.mubr.msk.f32.gmra.mrb[16].mxu1 %vm108_vm0, %v703_v16  ;;  %v705_v22 = vmax.f32 %v463_v17, 0.0 }
 0x111   :  { %v704_v20 = vmax.f32 %v458_v19, 0.0  ;;  %v2286_v21 = vpop.f32.mrb[20].mxu0 }
 0x112   :  { %v473_v23 = vadd.f32 %v2286_v21, %v2987_v25  ;;  %v467_v24 = vpop.f32.mrb[21].mxu0 }
 0x113   :  { %v468_v26 = vadd.f32 %v2987_v25, %v467_v24  ;;  %2393 = vmatprep.mubr.msk.f32.mxu1 %vm108_vm0, %v704_v20 }
 0x114   :  { %2394 = vmatmul.mubr.msk.f32.gmra.mrb[18].mxu1 %vm108_vm0, %v705_v22  ;;  %v707_v29 = vmax.f32 %v473_v23, 0.0 }
 0x115   :  { %v706_v27 = vmax.f32 %v468_v26, 0.0  ;;  %v2289_v28 = vpop.f32.mrb[22].mxu0 }
 0x116   :  { %v483_v30 = vadd.f32 %v2289_v28, %v2987_v25  ;;  %v477_v31 = vpop.f32.mrb[23].mxu0 }
 0x117   :  { %v478_v32 = vadd.f32 %v2987_v25, %v477_v31  ;;  %2396 = vmatprep.mubr.msk.f32.mxu1 %vm108_vm0, %v706_v27 }
 0x118   :  { %2397 = vmatmul.mubr.msk.f32.gmra.mrb[20].mxu1 %vm108_vm0, %v707_v29  ;;  %v709_v35 = vmax.f32 %v483_v30, 0.0 }
 0x119   :  { %v708_v33 = vmax.f32 %v478_v32, 0.0  ;;  %v2292_v34 = vpop.f32.mrb[24].mxu0 }
 0x11a   :  { %v493_v36 = vadd.f32 %v2292_v34, %v2987_v25  ;;  %v487_v37 = vpop.f32.mrb[25].mxu0 }
 0x11b   :  { %v488_v38 = vadd.f32 %v2987_v25, %v487_v37  ;;  %2399 = vmatprep.mubr.msk.f32.mxu1 %vm108_vm0, %v708_v33 }
 0x11c   :  { %2400 = vmatmul.mubr.msk.f32.gmra.mrb[22].mxu1 %vm108_vm0, %v709_v35  ;;  %v711_v41 = vmax.f32 %v493_v36, 0.0 }
 0x11d   :  { %v710_v39 = vmax.f32 %v488_v38, 0.0  ;;  %v2295_v40 = vpop.f32.mrb[26].mxu0 }
 0x11e   :  { %v503_v42 = vadd.f32 %v2295_v40, %v2987_v25  ;;  %v497_v43 = vpop.f32.mrb[27].mxu0 }
 0x11f   :  { %v498_v44 = vadd.f32 %v2987_v25, %v497_v43  ;;  %2402 = vmatprep.mubr.msk.f32.mxu1 %vm108_vm0, %v710_v39 }
 0x120   :  { %2403 = vmatmul.mubr.msk.f32.gmra.mrb[24].mxu1 %vm108_vm0, %v711_v41  ;;  %v713_v47 = vmax.f32 %v503_v42, 0.0 }
 0x121   :  { %v712_v45 = vmax.f32 %v498_v44, 0.0  ;;  %v2298_v46 = vpop.f32.mrb[28].mxu0 }
 0x122   :  { %v513_v48 = vadd.f32 %v2298_v46, %v2987_v25  ;;  %v507_v49 = vpop.f32.mrb[29].mxu0 }
 0x123   :  { %v508_v50 = vadd.f32 %v2987_v25, %v507_v49  ;;  %2405 = vmatprep.mubr.msk.f32.mxu1 %vm108_vm0, %v712_v45 }
 0x124   :  { %2406 = vmatmul.mubr.msk.f32.gmra.mrb[26].mxu1 %vm108_vm0, %v713_v47  ;;  %v715_v53 = vmax.f32 %v513_v48, 0.0 }
 0x125   :  { %v714_v51 = vmax.f32 %v508_v50, 0.0  ;;  %v2301_v52 = vpop.f32.mrb[30].mxu0 }
 0x126   :  { %v523_v54 = vadd.f32 %v2301_v52, %v2987_v25  ;;  %v517_v55 = vpop.f32.mrb[31].mxu0 }
 0x127   :  { %v518_v56 = vadd.f32 %v2987_v25, %v517_v55  ;;  %2408 = vmatprep.mubr.msk.f32.mxu1 %vm108_vm0, %v714_v51 }
 0x128   :  { %2409 = vmatmul.mubr.msk.f32.gmra.mrb[28].mxu1 %vm108_vm0, %v715_v53  ;;  %v717_v59 = vmax.f32 %v523_v54, 0.0 }
 0x129   :  { %v716_v57 = vmax.f32 %v518_v56, 0.0  ;;  %v2304_v58 = vpop.f32.mrb[32].mxu0 }
 0x12a   :  { %v533_v60 = vadd.f32 %v2304_v58, %v2987_v25  ;;  %v527_v61 = vpop.f32.mrb[33].mxu0 }
 0x12b   :  { %v528_v62 = vadd.f32 %v2987_v25, %v527_v61  ;;  %2411 = vmatprep.mubr.msk.f32.mxu1 %vm108_vm0, %v716_v57 }
 0x12c   :  { %2412 = vmatmul.mubr.msk.f32.gmra.mrb[30].mxu1 %vm108_vm0, %v717_v59  ;;  %v719_v1 = vmax.f32 %v533_v60, 0.0 }
 0x12d   :  { %v718_v63 = vmax.f32 %v528_v62, 0.0  ;;  %v2307_v0 = vpop.f32.mrb[34].mxu0 }
 0x12e   :  { %v543_v2 = vadd.f32 %v2307_v0, %v2987_v25  ;;  %v537_v3 = vpop.f32.mrb[35].mxu0 }
 0x12f   :  { %v538_v4 = vadd.f32 %v2987_v25, %v537_v3  ;;  %2414 = vmatprep.mubr.msk.f32.mxu1 %vm108_vm0, %v718_v63 }
 0x130   :  { %2415 = vmatmul.mubr.msk.f32.gmra.mrb[32].mxu1 %vm108_vm0, %v719_v1  ;;  %v721_v7 = vmax.f32 %v543_v2, 0.0 }
 0x131   :  { %v720_v5 = vmax.f32 %v538_v4, 0.0  ;;  %v2310_v6 = vpop.f32.mrb[36].mxu0 }
 0x132   :  { %v553_v8 = vadd.f32 %v2310_v6, %v2987_v25  ;;  %v547_v9 = vpop.f32.mrb[37].mxu0 }
 0x133   :  { %v548_v10 = vadd.f32 %v2987_v25, %v547_v9  ;;  %2417 = vmatprep.mubr.msk.f32.mxu1 %vm108_vm0, %v720_v5 }
 0x134   :  { %2418 = vmatmul.mubr.msk.f32.gmra.mrb[34].mxu1 %vm108_vm0, %v721_v7  ;;  %v723_v13 = vmax.f32 %v553_v8, 0.0 }
 0x135   :  { %v722_v11 = vmax.f32 %v548_v10, 0.0  ;;  %v2313_v12 = vpop.f32.mrb[38].mxu0 }
 0x136   :  { %v563_v14 = vadd.f32 %v2313_v12, %v2987_v25  ;;  %v557_v15 = vpop.f32.mrb[39].mxu0 }
 0x137   :  { %v558_v16 = vadd.f32 %v2987_v25, %v557_v15  ;;  %2420 = vmatprep.mubr.msk.f32.mxu1 %vm108_vm0, %v722_v11 }
 0x138   :  { %2421 = vmatmul.mubr.msk.f32.gmra.mrb[36].mxu1 %vm108_vm0, %v723_v13  ;;  %v725_v19 = vmax.f32 %v563_v14, 0.0 }
 0x139   :  { %v724_v17 = vmax.f32 %v558_v16, 0.0  ;;  %v2316_v18 = vpop.f32.mrb[40].mxu0 }
 0x13a   :  { %v573_v20 = vadd.f32 %v2316_v18, %v2987_v25  ;;  %v567_v21 = vpop.f32.mrb[41].mxu0 }
 0x13b   :  { %v568_v22 = vadd.f32 %v2987_v25, %v567_v21  ;;  %2423 = vmatprep.mubr.msk.f32.mxu1 %vm108_vm0, %v724_v17 }
 0x13c   :  { %2424 = vmatmul.mubr.msk.f32.gmra.mrb[38].mxu1 %vm108_vm0, %v725_v19  ;;  %v727_v26 = vmax.f32 %v573_v20, 0.0 }
 0x13d   :  { %v726_v23 = vmax.f32 %v568_v22, 0.0  ;;  %v2319_v24 = vpop.f32.mrb[42].mxu0 }
 0x13e   :  { %v583_v27 = vadd.f32 %v2319_v24, %v2987_v25  ;;  %v577_v28 = vpop.f32.mrb[43].mxu0 }
 0x13f   :  { %v578_v29 = vadd.f32 %v2987_v25, %v577_v28  ;;  %2426 = vmatprep.mubr.msk.f32.mxu1 %vm108_vm0, %v726_v23 }
 0x140   :  { %2427 = vmatmul.mubr.msk.f32.gmra.mrb[40].mxu1 %vm108_vm0, %v727_v26  ;;  %v729_v32 = vmax.f32 %v583_v27, 0.0 }
 0x141   :  { %v728_v30 = vmax.f32 %v578_v29, 0.0  ;;  %v2322_v31 = vpop.f32.mrb[44].mxu0  ;;  %v3120_v29 = vld [vmem:[%s3333_s4] ss:$0 sm:$0xff] }
 0x142   :  { %v593_v33 = vadd.f32 %v2322_v31, %v2987_v25  ;;  %v587_v34 = vpop.f32.mrb[45].mxu0 }
 0x143   :  { %v588_v35 = vadd.f32 %v2987_v25, %v587_v34  ;;  %2429 = vmatprep.mubr.msk.f32.mxu1 %vm108_vm0, %v728_v30 }
 0x144   :  { %2430 = vmatmul.mubr.msk.f32.gmra.mrb[42].mxu1 %vm108_vm0, %v729_v32  ;;  %v731_v38 = vmax.f32 %v593_v33, 0.0 }
 0x145   :  { %v730_v36 = vmax.f32 %v588_v35, 0.0  ;;  %v2325_v37 = vpop.f32.mrb[46].mxu0 }
 0x146   :  { %v603_v39 = vadd.f32 %v2325_v37, %v2987_v25  ;;  %v597_v40 = vpop.f32.mrb[47].mxu0 }
 0x147   :  { %v598_v41 = vadd.f32 %v2987_v25, %v597_v40  ;;  %2432 = vmatprep.mubr.msk.f32.mxu1 %vm108_vm0, %v730_v36 }
 0x148   :  { %2433 = vmatmul.mubr.msk.f32.gmra.mrb[44].mxu1 %vm108_vm0, %v731_v38  ;;  %v733_v44 = vmax.f32 %v603_v39, 0.0 }
 0x149   :  { %v732_v42 = vmax.f32 %v598_v41, 0.0  ;;  %v2328_v43 = vpop.f32.mrb[48].mxu0 }
 0x14a   :  { %v613_v45 = vadd.f32 %v2328_v43, %v2987_v25  ;;  %v607_v46 = vpop.f32.mrb[49].mxu0 }
 0x14b   :  { %v608_v47 = vadd.f32 %v2987_v25, %v607_v46  ;;  %2435 = vmatprep.mubr.msk.f32.mxu1 %vm108_vm0, %v732_v42 }
 0x14c   :  { %2436 = vmatmul.mubr.msk.f32.gmra.mrb[46].mxu1 %vm108_vm0, %v733_v44  ;;  %v735_v50 = vmax.f32 %v613_v45, 0.0 }
 0x14d   :  { %v734_v48 = vmax.f32 %v608_v47, 0.0  ;;  %v2331_v49 = vpop.f32.mrb[50].mxu0 }
 0x14e   :  { %v623_v51 = vadd.f32 %v2331_v49, %v2987_v25  ;;  %v617_v52 = vpop.f32.mrb[51].mxu0 }
 0x14f   :  { %2438 = vmatprep.mubr.msk.f32.mxu1 %vm108_vm0, %v734_v48  ;;  %v618_v53 = vadd.f32 %v2987_v25, %v617_v52 }
 0x150   :  { %2439 = vmatmul.mubr.msk.f32.gmra.mrb[48].mxu1 %vm108_vm0, %v735_v50  ;;  %v737_v54 = vmax.f32 %v623_v51, 0.0 }
 0x151   :  { %v736_v55 = vmax.f32 %v618_v53, 0.0  ;;  %v2334_v56 = vpop.f32.mrb[52].mxu0 }
 0x152   :  { %v633_v57 = vadd.f32 %v2334_v56, %v2987_v25  ;;  %v627_v58 = vpop.f32.mrb[53].mxu0 }
 0x153   :  { %2441 = vmatprep.mubr.msk.f32.mxu1 %vm108_vm0, %v736_v55  ;;  %v628_v59 = vadd.f32 %v2987_v25, %v627_v58 }
 0x154   :  { %2442 = vmatmul.mubr.msk.f32.gmra.mrb[50].mxu1 %vm108_vm0, %v737_v54  ;;  %v739_v60 = vmax.f32 %v633_v57, 0.0 }
 0x155   :  { %v738_v61 = vmax.f32 %v628_v59, 0.0  ;;  %v2337_v62 = vpop.f32.mrb[54].mxu0 }
 0x156   :  { %v643_v63 = vadd.f32 %v2337_v62, %v2987_v25  ;;  %v637_v0 = vpop.f32.mrb[55].mxu0 }
 0x157   :  { %2444 = vmatprep.mubr.msk.f32.mxu1 %vm108_vm0, %v738_v61  ;;  %v638_v1 = vadd.f32 %v2987_v25, %v637_v0 }
 0x158   :  { %2445 = vmatmul.mubr.msk.f32.gmra.mrb[52].mxu1 %vm108_vm0, %v739_v60  ;;  %v741_v2 = vmax.f32 %v643_v63, 0.0 }
 0x159   :  { %v740_v3 = vmax.f32 %v638_v1, 0.0  ;;  %v2340_v4 = vpop.f32.mrb[56].mxu0 }
 0x15a   :  { %v653_v5 = vadd.f32 %v2340_v4, %v2987_v25  ;;  %v647_v6 = vpop.f32.mrb[57].mxu0 }
 0x15b   :  { %2447 = vmatprep.mubr.msk.f32.mxu1 %vm108_vm0, %v740_v3  ;;  %v648_v7 = vadd.f32 %v2987_v25, %v647_v6 }
 0x15c   :  { %2448 = vmatmul.mubr.msk.f32.gmra.mrb[54].mxu1 %vm108_vm0, %v741_v2  ;;  %v743_v8 = vmax.f32 %v653_v5, 0.0 }
 0x15d   :  { %v742_v9 = vmax.f32 %v648_v7, 0.0  ;;  %v2343_v10 = vpop.f32.mrb[58].mxu0 }
 0x15e   :  { %v663_v11 = vadd.f32 %v2343_v10, %v2987_v25  ;;  %v657_v12 = vpop.f32.mrb[59].mxu0 }
 0x15f   :  { %2450 = vmatprep.mubr.msk.f32.mxu1 %vm108_vm0, %v742_v9  ;;  %v658_v13 = vadd.f32 %v2987_v25, %v657_v12 }
 0x160   :  { %2451 = vmatmul.mubr.msk.f32.gmra.mrb[56].mxu1 %vm108_vm0, %v743_v8  ;;  %v745_v14 = vmax.f32 %v663_v11, 0.0 }
 0x161   :  { %v744_v15 = vmax.f32 %v658_v13, 0.0  ;;  %v2346_v16 = vpop.f32.mrb[60].mxu0 }
 0x162   :  { %v673_v17 = vadd.f32 %v2346_v16, %v2987_v25  ;;  %v667_v18 = vpop.f32.mrb[61].mxu0 }
 0x163   :  { %2453 = vmatprep.mubr.msk.f32.mxu1 %vm108_vm0, %v744_v15  ;;  %v668_v19 = vadd.f32 %v2987_v25, %v667_v18 }
 0x164   :  { %2454 = vmatmul.mubr.msk.f32.gmra.mrb[58].mxu1 %vm108_vm0, %v745_v14  ;;  %v747_v20 = vmax.f32 %v673_v17, 0.0 }
 0x165   :  { %v746_v21 = vmax.f32 %v668_v19, 0.0  ;;  %v2349_v22 = vpop.f32.mrb[62].mxu0 }
 0x166   :  { %v683_v23 = vadd.f32 %v2349_v22, %v2987_v25  ;;  %v677_v24 = vpop.f32.mrb[63].mxu0 }
 0x167   :  { %2456 = vmatprep.mubr.msk.f32.mxu1 %vm108_vm0, %v746_v21  ;;  %v678_v26 = vadd.f32 %v2987_v25, %v677_v24 }
 0x168   :  { %2457 = vmatmul.mubr.msk.f32.gmra.mrb[60].mxu1 %vm108_vm0, %v747_v20  ;;  %v749_v27 = vmax.f32 %v683_v23, 0.0  ;;  %v3156_v23 = vld [vmem:[%s3334_s5] sm:$0x1]  ;;  %s2636_s5 = smov [#allocation3]  }
 0x169   :  { %v748_v28 = vmax.f32 %v678_v26, 0.0  ;;  %2202 = vmatprep.mubr.msk.f32.mxu0 %vm108_vm0, %v3156_v23  ;;  %s1818_s13 = sshll.u32 %s2636_s5, 4  ;;  %s1819_s13 = int_to_ptr.vmem [resolvable:$true] %s1818_s13 }
 0x16a   :  { %s2610_s14 = scalar_lea.vmem %s1819_s13, 64  ;;  %p2615_p1 = scmp.lt.s32.totalorder %s1819_s13, %s1819_s13 }
 0x16b   :  { %2459 = vmatprep.mubr.msk.f32.mxu1 %vm108_vm0, %v748_v28  ;;  %p2611_p0 = scmp.ne.s32.totalorder %s1819_s13, %s2610_s14  ;;  %p2616_p2 = scmp.lt.s32.totalorder %s2610_s14, %s2610_s14 }
 0x16c   :  { %2460 = vmatmul.mubr.msk.f32.gmra.mrb[62].mxu1 %vm108_vm0, %v749_v27 }
 0x16d   :  { %2236 = vmatprep.mubr.msk.f32.mxu1 %vm108_vm0, %v3156_v23  ;;  %p2617_p3 = por %p2616_p2, %p2615_p1 }
 0x16f   :  { %p2618_p4 = pnand %p2617_p3, %p2611_p0 }
 0x1c3   :  { %v2368_v30 = vpop.f32.mrb[0].mxu1 }
 0x1c4   :  { %v1029_v31 = vadd.f32 %v2368_v30, %v3120_v29  ;;  %v1023_v32 = vpop.f32.mrb[1].mxu1 }
 0x1c5   :  { %v1024_v33 = vadd.f32 %v3120_v29, %v1023_v32 }
 0x1c6   :  { %v1343_v25 = vmax.f32 %v1029_v31, 0.0 }
 0x1c7   :  { %v1342_v34 = vmax.f32 %v1024_v33, 0.0  ;;  %v2371_v35 = vpop.f32.mrb[2].mxu1 }
 0x1c8   :  { %v1039_v36 = vadd.f32 %v2371_v35, %v3120_v29  ;;  %v1033_v37 = vpop.f32.mrb[3].mxu1 }
 0x1c9   :  { %v3125_v38 = vpack.c.bf16 %v1343_v25, %v1342_v34  ;;  %v1034_v39 = vadd.f32 %v3120_v29, %v1033_v37 }
 0x1ca   :  { %v1345_v40 = vmax.f32 %v1039_v36, 0.0 }
 0x1cb   :  { %v1344_v41 = vmax.f32 %v1034_v39, 0.0  ;;  %v2374_v42 = vpop.f32.mrb[4].mxu1  ;;  %v1407_v39 = vld [vmem:[#allocation2] sm:$0x1] }
 0x1cc   :  { %v1049_v43 = vadd.f32 %v2374_v42, %v3120_v29  ;;  %v1043_v44 = vpop.f32.mrb[5].mxu1  ;;  %v2634_v42 = vmov 0  }
 0x1cd   :  { %v3129_v45 = vpack.c.bf16 %v1345_v40, %v1344_v41  ;;  %v1044_v46 = vadd.f32 %v3120_v29, %v1043_v44  ;;  %2593 = vset.pattern.permute.xlu0 %v2634_v42 }
 0x1ce   :  { %v1347_v47 = vmax.f32 %v1049_v43, 0.0  ;;  %1410 = vperm.xlu0 %2593, %v1407_v39  }
 0x1cf   :  { %v1346_v48 = vmax.f32 %v1044_v46, 0.0  ;;  %v2377_v49 = vpop.f32.mrb[6].mxu1 }
 0x1d0   :  { %v1059_v50 = vadd.f32 %v2377_v49, %v3120_v29  ;;  %v1053_v51 = vpop.f32.mrb[7].mxu1 }
 0x1d1   :  { %v3133_v52 = vpack.c.bf16 %v1347_v47, %v1346_v48  ;;  %v1054_v53 = vadd.f32 %v3120_v29, %v1053_v51 }
 0x1d2   :  { %v1349_v54 = vmax.f32 %v1059_v50, 0.0 }
 0x1d3   :  { %v1348_v55 = vmax.f32 %v1054_v53, 0.0  ;;  %v2380_v56 = vpop.f32.mrb[8].mxu1 }
 0x1d4   :  { %v1069_v57 = vadd.f32 %v2380_v56, %v3120_v29  ;;  %v1063_v58 = vpop.f32.mrb[9].mxu1 }
 0x1d5   :  { %v3137_v59 = vpack.c.bf16 %v1349_v54, %v1348_v55  ;;  %v1064_v60 = vadd.f32 %v3120_v29, %v1063_v58 }
 0x1d6   :  { %v1351_v61 = vmax.f32 %v1069_v57, 0.0 }
 0x1d7   :  { %v1350_v62 = vmax.f32 %v1064_v60, 0.0  ;;  %v2383_v63 = vpop.f32.mrb[10].mxu1 }
 0x1d8   :  { %v1079_v0 = vadd.f32 %v2383_v63, %v3120_v29  ;;  %v1073_v1 = vpop.f32.mrb[11].mxu1 }
 0x1d9   :  { %v3141_v2 = vpack.c.bf16 %v1351_v61, %v1350_v62  ;;  %v1074_v3 = vadd.f32 %v3120_v29, %v1073_v1 }
 0x1da   :  { %v1353_v4 = vmax.f32 %v1079_v0, 0.0 }
 0x1db   :  { %v1352_v5 = vmax.f32 %v1074_v3, 0.0  ;;  %v2386_v6 = vpop.f32.mrb[12].mxu1 }
 0x1dc   :  { %v1089_v7 = vadd.f32 %v2386_v6, %v3120_v29  ;;  %v1083_v8 = vpop.f32.mrb[13].mxu1 }
 0x1dd   :  { %v3145_v9 = vpack.c.bf16 %v1353_v4, %v1352_v5  ;;  %v1084_v10 = vadd.f32 %v3120_v29, %v1083_v8 }
 0x1de   :  { %v1355_v11 = vmax.f32 %v1089_v7, 0.0 }
 0x1df   :  { %v1354_v12 = vmax.f32 %v1084_v10, 0.0  ;;  %v2389_v13 = vpop.f32.mrb[14].mxu1 }
 0x1e0   :  { %v1099_v14 = vadd.f32 %v2389_v13, %v3120_v29  ;;  %v1093_v15 = vpop.f32.mrb[15].mxu1 }
 0x1e1   :  { %v3149_v16 = vpack.c.bf16 %v1355_v11, %v1354_v12  ;;  %v1094_v17 = vadd.f32 %v3120_v29, %v1093_v15 }
 0x1e2   :  { %v1357_v18 = vmax.f32 %v1099_v14, 0.0 }
 0x1e3   :  { %v1356_v19 = vmax.f32 %v1094_v17, 0.0  ;;  %v2392_v20 = vpop.f32.mrb[16].mxu1 }
 0x1e4   :  { %v1109_v21 = vadd.f32 %v2392_v20, %v3120_v29  ;;  %v1103_v22 = vpop.f32.mrb[17].mxu1 }
 0x1e5   :  { %v3158_v24 = vpack.c.bf16 %v1357_v18, %v1356_v19  ;;  %v1104_v26 = vadd.f32 %v3120_v29, %v1103_v22 }
 0x1e6   :  { %v1359_v27 = vmax.f32 %v1109_v21, 0.0 }
 0x1e7   :  { %v1358_v28 = vmax.f32 %v1104_v26, 0.0  ;;  %v2395_v30 = vpop.f32.mrb[18].mxu1 }
 0x1e8   :  { %v1119_v31 = vadd.f32 %v2395_v30, %v3120_v29  ;;  %v1113_v32 = vpop.f32.mrb[19].mxu1 }
 0x1e9   :  { %v2494_v25 = vpack.c.bf16 %v1359_v27, %v1358_v28  ;;  %v1114_v34 = vadd.f32 %v3120_v29, %v1113_v32 }
 0x1ea   :  { %v1361_v35 = vmax.f32 %v1119_v31, 0.0 }
 0x1eb   :  { %v1360_v36 = vmax.f32 %v1114_v34, 0.0  ;;  %v2398_v37 = vpop.f32.mrb[20].mxu1  ;;  %2496 = vmatprep.subr.msk.bf16.mxu0 %vm3168_vm1, %v2494_v25 }
 0x1ec   :  { %v1129_v40 = vadd.f32 %v2398_v37, %v3120_v29  ;;  %v1123_v41 = vpop.f32.mrb[21].mxu1  ;;  %2499 = vmatpush3.bf16.xpose.msk.msra.mxu0 %vm3168_vm1, %v3125_v38 }
 0x1ed   :  { %v2500_v43 = vpack.c.bf16 %v1361_v35, %v1360_v36  ;;  %v1124_v44 = vadd.f32 %v3120_v29, %v1123_v41 }
 0x1ee   :  { %v1363_v46 = vmax.f32 %v1129_v40, 0.0 }
 0x1ef   :  { %v1362_v47 = vmax.f32 %v1124_v44, 0.0  ;;  %v2401_v48 = vpop.f32.mrb[22].mxu1  ;;  %2502 = vmatprep.subr.msk.bf16.mxu0 %vm3168_vm1, %v2500_v43 }
 0x1f0   :  { %v1139_v49 = vadd.f32 %v2401_v48, %v3120_v29  ;;  %v1133_v50 = vpop.f32.mrb[23].mxu1 }
 0x1f1   :  { %v2506_v51 = vpack.c.bf16 %v1363_v46, %v1362_v47  ;;  %v1134_v53 = vadd.f32 %v3120_v29, %v1133_v50 }
 0x1f2   :  { %v1365_v54 = vmax.f32 %v1139_v49, 0.0 }
 0x1f3   :  { %v1364_v38 = vmax.f32 %v1134_v53, 0.0  ;;  %v2404_v55 = vpop.f32.mrb[24].mxu1 }
 0x1f4   :  { %v1149_v56 = vadd.f32 %v2404_v55, %v3120_v29  ;;  %v1143_v57 = vpop.f32.mrb[25].mxu1  ;;  %2505 = vmatpush3.bf16.xpose.msk.msra.mxu0 %vm3168_vm1, %v3129_v45 }
 0x1f5   :  { %v2512_v58 = vpack.c.bf16 %v1365_v54, %v1364_v38  ;;  %v1144_v60 = vadd.f32 %v3120_v29, %v1143_v57  ;;  %2508 = vmatprep.subr.msk.bf16.mxu0 %vm3168_vm1, %v2506_v51 }
 0x1f6   :  { %v1367_v61 = vmax.f32 %v1149_v56, 0.0 }
 0x1f7   :  { %v1366_v62 = vmax.f32 %v1144_v60, 0.0  ;;  %v2407_v63 = vpop.f32.mrb[26].mxu1 }
 0x1f8   :  { %v1159_v0 = vadd.f32 %v2407_v63, %v3120_v29  ;;  %v1153_v1 = vpop.f32.mrb[27].mxu1 }
 0x1f9   :  { %v2518_v3 = vpack.c.bf16 %v1367_v61, %v1366_v62  ;;  %v1154_v4 = vadd.f32 %v3120_v29, %v1153_v1 }
 0x1fa   :  { %v1369_v5 = vmax.f32 %v1159_v0, 0.0 }
 0x1fb   :  { %v1368_v6 = vmax.f32 %v1154_v4, 0.0  ;;  %v2410_v7 = vpop.f32.mrb[28].mxu1 }
 0x1fc   :  { %v1169_v45 = vadd.f32 %v2410_v7, %v3120_v29  ;;  %v1163_v8 = vpop.f32.mrb[29].mxu1  ;;  %2511 = vmatpush3.bf16.xpose.msk.msra.mxu0 %vm3168_vm1, %v3133_v52 }
 0x1fd   :  { %v2524_v10 = vpack.c.bf16 %v1369_v5, %v1368_v6  ;;  %v1164_v11 = vadd.f32 %v3120_v29, %v1163_v8  ;;  %2514 = vmatprep.subr.msk.bf16.mxu0 %vm3168_vm1, %v2512_v58 }
 0x1fe   :  { %v1371_v12 = vmax.f32 %v1169_v45, 0.0 }
 0x1ff   :  { %v1370_v13 = vmax.f32 %v1164_v11, 0.0  ;;  %v2413_v14 = vpop.f32.mrb[30].mxu1 }
 0x200   :  { %v1179_v15 = vadd.f32 %v2413_v14, %v3120_v29  ;;  %v1173_v17 = vpop.f32.mrb[31].mxu1 }
 0x201   :  { %v2530_v18 = vpack.c.bf16 %v1371_v12, %v1370_v13  ;;  %v1174_v19 = vadd.f32 %v3120_v29, %v1173_v17 }
 0x202   :  { %v1373_v20 = vmax.f32 %v1179_v15, 0.0 }
 0x203   :  { %v1372_v21 = vmax.f32 %v1174_v19, 0.0  ;;  %v2416_v22 = vpop.f32.mrb[32].mxu1 }
 0x204   :  { %v1189_v52 = vadd.f32 %v2416_v22, %v3120_v29  ;;  %v1183_v26 = vpop.f32.mrb[33].mxu1  ;;  %2517 = vmatpush3.bf16.xpose.msk.msra.mxu0 %vm3168_vm1, %v3137_v59 }
 0x205   :  { %v2536_v27 = vpack.c.bf16 %v1373_v20, %v1372_v21  ;;  %v1184_v28 = vadd.f32 %v3120_v29, %v1183_v26  ;;  %2520 = vmatprep.subr.msk.bf16.mxu0 %vm3168_vm1, %v2518_v3 }
 0x206   :  { %v1375_v30 = vmax.f32 %v1189_v52, 0.0 }
 0x207   :  { %v1374_v31 = vmax.f32 %v1184_v28, 0.0  ;;  %v2419_v32 = vpop.f32.mrb[34].mxu1 }
 0x208   :  { %v1199_v25 = vadd.f32 %v2419_v32, %v3120_v29  ;;  %v1193_v34 = vpop.f32.mrb[35].mxu1 }
 0x209   :  { %v3210_v35 = vpack.c.bf16 %v1375_v30, %v1374_v31  ;;  %v1194_v36 = vadd.f32 %v3120_v29, %v1193_v34 }
 0x20a   :  { %v1377_v37 = vmax.f32 %v1199_v25, 0.0 }
 0x20b   :  { %v1376_v39 = vmax.f32 %v1194_v36, 0.0  ;;  %v2422_v40 = vpop.f32.mrb[36].mxu1 }
 0x20c   :  { %v1209_v59 = vadd.f32 %v2422_v40, %v3120_v29  ;;  %v1203_v41 = vpop.f32.mrb[37].mxu1  ;;  %2523 = vmatpush3.bf16.xpose.msk.msra.mxu0 %vm3168_vm1, %v3141_v2 }
 0x20d   :  { %v3217_v42 = vpack.c.bf16 %v1377_v37, %v1376_v39  ;;  %v1204_v43 = vadd.f32 %v3120_v29, %v1203_v41  ;;  %2526 = vmatprep.subr.msk.bf16.mxu0 %vm3168_vm1, %v2524_v10 }
 0x20e   :  { %v1379_v44 = vmax.f32 %v1209_v59, 0.0 }
 0x20f   :  { %v1378_v46 = vmax.f32 %v1204_v43, 0.0  ;;  %v2425_v47 = vpop.f32.mrb[38].mxu1 }
 0x210   :  { %v1219_v48 = vadd.f32 %v2425_v47, %v3120_v29  ;;  %v1213_v49 = vpop.f32.mrb[39].mxu1 }
 0x211   :  { %v3223_v50 = vpack.c.bf16 %v1379_v44, %v1378_v46  ;;  %v1214_v51 = vadd.f32 %v3120_v29, %v1213_v49 }
 0x212   :  { %v1381_v53 = vmax.f32 %v1219_v48, 0.0 }
 0x213   :  { %v1380_v54 = vmax.f32 %v1214_v51, 0.0  ;;  %v2428_v2 = vpop.f32.mrb[40].mxu1 }
 0x214   :  { %v1229_v38 = vadd.f32 %v2428_v2, %v3120_v29  ;;  %v1223_v55 = vpop.f32.mrb[41].mxu1  ;;  %2529 = vmatpush3.bf16.xpose.msk.msra.mxu0 %vm3168_vm1, %v3145_v9 }
 0x215   :  { %v3230_v56 = vpack.c.bf16 %v1381_v53, %v1380_v54  ;;  %v1224_v57 = vadd.f32 %v3120_v29, %v1223_v55  ;;  %2532 = vmatprep.subr.msk.bf16.mxu0 %vm3168_vm1, %v2530_v18 }
 0x216   :  { %v1383_v58 = vmax.f32 %v1229_v38, 0.0 }
 0x217   :  { %v1382_v60 = vmax.f32 %v1224_v57, 0.0  ;;  %v2431_v61 = vpop.f32.mrb[42].mxu1 }
 0x218   :  { %v1239_v62 = vadd.f32 %v2431_v61, %v3120_v29  ;;  %v1233_v63 = vpop.f32.mrb[43].mxu1 }
 0x219   :  { %v3236_v0 = vpack.c.bf16 %v1383_v58, %v1382_v60  ;;  %v1234_v1 = vadd.f32 %v3120_v29, %v1233_v63 }
 0x21a   :  { %v1385_v3 = vmax.f32 %v1239_v62, 0.0 }
 0x21b   :  { %v1384_v4 = vmax.f32 %v1234_v1, 0.0  ;;  %v2434_v9 = vpop.f32.mrb[44].mxu1 }
 0x21c   :  { %v1249_v5 = vadd.f32 %v2434_v9, %v3120_v29  ;;  %v1243_v6 = vpop.f32.mrb[45].mxu1  ;;  %2535 = vmatpush3.bf16.xpose.msk.msra.mxu0 %vm3168_vm1, %v3149_v16 }
 0x21d   :  { %v3243_v7 = vpack.c.bf16 %v1385_v3, %v1384_v4  ;;  %v1244_v45 = vadd.f32 %v3120_v29, %v1243_v6  ;;  %2538 = vmatprep.subr.msk.bf16.mxu0 %vm3168_vm1, %v2536_v27 }
 0x21e   :  { %v1387_v8 = vmax.f32 %v1249_v5, 0.0 }
 0x21f   :  { %v1386_v10 = vmax.f32 %v1244_v45, 0.0  ;;  %v2437_v11 = vpop.f32.mrb[46].mxu1 }
 0x220   :  { %v1259_v12 = vadd.f32 %v2437_v11, %v3120_v29  ;;  %v1253_v13 = vpop.f32.mrb[47].mxu1 }
 0x221   :  { %v3249_v14 = vpack.c.bf16 %v1387_v8, %v1386_v10  ;;  %v1254_v15 = vadd.f32 %v3120_v29, %v1253_v13 }
 0x222   :  { %v1389_v17 = vmax.f32 %v1259_v12, 0.0 }
 0x223   :  { %v1388_v18 = vmax.f32 %v1254_v15, 0.0  ;;  %v2440_v16 = vpop.f32.mrb[48].mxu1 }
 0x224   :  { %v1269_v19 = vadd.f32 %v2440_v16, %v3120_v29  ;;  %v1263_v20 = vpop.f32.mrb[49].mxu1  ;;  %2541 = vmatpush3.bf16.xpose.msk.msra.mxu0 %vm3168_vm1, %v3158_v24 }
 0x225   :  { %v3256_v21 = vpack.c.bf16 %v1389_v17, %v1388_v18  ;;  %v1264_v22 = vadd.f32 %v3120_v29, %v1263_v20 }
 0x226   :  { %v1391_v52 = vmax.f32 %v1269_v19, 0.0 }
 0x227   :  { %v1390_v26 = vmax.f32 %v1264_v22, 0.0  ;;  %v2443_v27 = vpop.f32.mrb[50].mxu1 }
 0x228   :  { %v1279_v28 = vadd.f32 %v2443_v27, %v3120_v29  ;;  %v1273_v30 = vpop.f32.mrb[51].mxu1 }
 0x229   :  { %v2542_v31 = vpack.c.bf16 %v1391_v52, %v1390_v26  ;;  %v1274_v32 = vadd.f32 %v3120_v29, %v1273_v30 }
 0x22a   :  { %v1393_v25 = vmax.f32 %v1279_v28, 0.0 }
 0x22b   :  { %2544 = vmatprep.subr.msk.bf16.mxu1 %vm3168_vm1, %v2542_v31  ;;  %v1392_v34 = vmax.f32 %v1274_v32, 0.0  ;;  %v2446_v36 = vpop.f32.mrb[52].mxu1  ;;  %2203 = vmatmul.mubr.msk.f32.vlgmr.msra.gmra.mrb[64].mxu0 %vm108_vm0, %v3156_v23 }
 0x22c   :  { %2547 = vmatpush3.bf16.xpose.msk.msra.mxu1 %vm3168_vm1, %v3210_v35  ;;  %v1289_v24 = vadd.f32 %v2446_v36, %v3120_v29  ;;  %v1283_v37 = vpop.f32.mrb[53].mxu1 }
 0x22d   :  { %v2548_v39 = vpack.c.bf16 %v1393_v25, %v1392_v34  ;;  %v1284_v40 = vadd.f32 %v3120_v29, %v1283_v37 }
 0x22e   :  { %v1395_v59 = vmax.f32 %v1289_v24, 0.0 }
 0x22f   :  { %2550 = vmatprep.subr.msk.bf16.mxu1 %vm3168_vm1, %v2548_v39  ;;  %v1394_v41 = vmax.f32 %v1284_v40, 0.0  ;;  %v2449_v43 = vpop.f32.mrb[54].mxu1 }
 0x230   :  { %v1299_v44 = vadd.f32 %v2449_v43, %v3120_v29  ;;  %v1293_v46 = vpop.f32.mrb[55].mxu1  ;;  %v2635_v43 = vmov 1966171168  }
 0x231   :  { %v2554_v47 = vpack.c.bf16 %v1395_v59, %v1394_v41  ;;  %v1294_v48 = vadd.f32 %v3120_v29, %v1293_v46 }
 0x232   :  { %v1397_v49 = vmax.f32 %v1299_v44, 0.0  ;;  %v1785_v44 = vunpack.c.l.s4 %v2635_v43 }
 0x233   :  { %v1396_v35 = vmax.f32 %v1294_v48, 0.0  ;;  %v2452_v51 = vpop.f32.mrb[56].mxu1 }
 0x234   :  { %2553 = vmatpush3.bf16.xpose.msk.msra.mxu1 %vm3168_vm1, %v3217_v42  ;;  %v1309_v53 = vadd.f32 %v2452_v51, %v3120_v29  ;;  %v1303_v54 = vpop.f32.mrb[57].mxu1  ;;  %v1786_v46 = vunpack.c.0.s8 %v1785_v44 }
 0x235   :  { %2556 = vmatprep.subr.msk.bf16.mxu1 %vm3168_vm1, %v2554_v47  ;;  %v2560_v2 = vpack.c.bf16 %v1397_v49, %v1396_v35  ;;  %v1304_v38 = vadd.f32 %v3120_v29, %v1303_v54 }
 0x236   :  { %v1399_v55 = vmax.f32 %v1309_v53, 0.0 }
 0x237   :  { %v1398_v57 = vmax.f32 %v1304_v38, 0.0  ;;  %v2455_v58 = vpop.f32.mrb[58].mxu1 }
 0x238   :  { %v1319_v60 = vadd.f32 %v2455_v58, %v3120_v29  ;;  %v1313_v61 = vpop.f32.mrb[59].mxu1 }
 0x239   :  { %v2566_v62 = vpack.c.bf16 %v1399_v55, %v1398_v57  ;;  %v1314_v63 = vadd.f32 %v3120_v29, %v1313_v61 }
 0x23a   :  { %v1401_v1 = vmax.f32 %v1319_v60, 0.0 }
 0x23b   :  { %v1400_v42 = vmax.f32 %v1314_v63, 0.0  ;;  %v2458_v3 = vpop.f32.mrb[60].mxu1 }
 0x23c   :  { %2559 = vmatpush3.bf16.xpose.msk.msra.mxu1 %vm3168_vm1, %v3223_v50  ;;  %v1329_v4 = vadd.f32 %v2458_v3, %v3120_v29  ;;  %v1323_v9 = vpop.f32.mrb[61].mxu1 }
 0x23d   :  { %2562 = vmatprep.subr.msk.bf16.mxu1 %vm3168_vm1, %v2560_v2  ;;  %v2572_v5 = vpack.c.bf16 %v1401_v1, %v1400_v42  ;;  %v1324_v6 = vadd.f32 %v3120_v29, %v1323_v9 }
 0x23e   :  { %v1403_v45 = vmax.f32 %v1329_v4, 0.0 }
 0x23f   :  { %v1402_v8 = vmax.f32 %v1324_v6, 0.0  ;;  %v2461_v10 = vpop.f32.mrb[62].mxu1 }
 0x240   :  { %v1339_v11 = vadd.f32 %v2461_v10, %v3120_v29  ;;  %v1333_v12 = vpop.f32.mrb[63].mxu1 }
 0x241   :  { %v2578_v13 = vpack.c.bf16 %v1403_v45, %v1402_v8  ;;  %v1334_v15 = vadd.f32 %v3120_v29, %v1333_v12  ;;  %v1413_v29 = vlaneseq }
 0x242   :  { %v1405_v17 = vmax.f32 %v1339_v11, 0.0 }
 0x243   :  { %v1404_v50 = vmax.f32 %v1334_v15, 0.0  ;;  %vm1809_vm2 = vcmp.lt.s32.totalorder %v1413_v29, 512 }
 0x244   :  { %2565 = vmatpush3.bf16.xpose.msk.msra.mxu1 %vm3168_vm1, %v3230_v56  ;;  %v1414_v56 = vshrl.u32 %v1413_v29, 7 }
 0x245   :  { %2568 = vmatprep.subr.msk.bf16.mxu1 %vm3168_vm1, %v2566_v62  ;;  %v2584_v18 = vpack.c.bf16 %v1405_v17, %v1404_v50 }
 0x246   :  { %v1789_v47 = vsub.s32 %v1786_v46, %v1414_v56 }
 0x24c   :  { %2571 = vmatpush3.bf16.xpose.msk.msra.mxu1 %vm3168_vm1, %v3236_v0  ;;  %v1415_v0 = vsub.s32 0, %v1414_v56 }
 0x24d   :  { %2574 = vmatprep.subr.msk.bf16.mxu1 %vm3168_vm1, %v2572_v5 }
 0x254   :  { %2577 = vmatpush3.bf16.xpose.msk.msra.mxu1 %vm3168_vm1, %v3243_v7  ;;  %v1411_v7 = vpop.permute.xlu0 %1410 }
 0x255   :  { %2580 = vmatprep.subr.msk.bf16.mxu1 %vm3168_vm1, %v2578_v13  ;;  %v1416_v16 = vrot.slane %v1411_v7, %v1415_v0 }
 0x25c   :  { %2583 = vmatpush3.bf16.xpose.msk.msra.mxu1 %vm3168_vm1, %v3249_v14 }
 0x25d   :  { %2586 = vmatprep.subr.msk.bf16.mxu1 %vm3168_vm1, %v2584_v18 }
 0x264   :  { %2589 = vmatpush3.bf16.xpose.msk.msra.mxu1 %vm3168_vm1, %v3256_v21 }
 0x26b   :  { %2237 = vmatmul.mubr.msk.f32.vlgmr.msra.gmra.mrb[64].mxu1 %vm108_vm0, %v3156_v23 }
 0x2fe   :  { %v1678_v19 = vpop.f32.mrb[64].mxu0 }
 0x2ff   :  { %v1679_v20 = vadd.f32 %v1678_v19, %v1416_v16  ;;  %v1680_v22 = vpop.f32.mrb[65].mxu0 }
 0x300   :  { %v1681_v52 = vadd.f32 %v1680_v22, %v1416_v16 }
 0x301   :  { %v2022_v14 = vmul.f32 -1.442695, %v1679_v20 }
 0x302   :  { %v2023_v26 = vmul.f32 -1.442695, %v1681_v52 }
 0x303   :  { %2594 = vpow2.f32 %v2022_v14 }
 0x304   :  { %2596 = vpow2.f32 %v2023_v26 }
 0x30d   :  { %v2595_v27 = vpop.eup %2594 }
 0x30e   :  { %v2597_v28 = vpop.eup %2596  ;;  %v1766_v33 = vadd.f32 1.0, %v2595_v27 }
 0x30f   :  { %v1767_v21 = vadd.f32 1.0, %v2597_v28 }
 0x310   :  { %2598 = vrcp.f32 %v1766_v33 }
 0x311   :  { %2600 = vrcp.f32 %v1767_v21 }
 0x31a   :  { %v2599_v23 = vpop.eup %2598 }
 0x31b   :  { %v2601_v30 = vpop.eup %2600 }
 0x31c   :  { %v1782_v31 = vcombine.low %v2599_v23, %v2601_v30 }
 0x31e   :  { %v1790_v51 = vrot.slane %v1782_v31, %v1789_v47 }
 0x33e   :  { %v1749_v32 = vpop.f32.mrb[64].mxu1 }
 0x33f   :  { %v1750_v25 = vadd.f32 %v1749_v32, %v1416_v16  ;;  %v1751_v34 = vpop.f32.mrb[65].mxu1 }
 0x340   :  { %v1752_v36 = vadd.f32 %v1751_v34, %v1416_v16 }
 0x341   :  { %v2024_v24 = vmul.f32 -1.442695, %v1750_v25 }
 0x342   :  { %v2025_v37 = vmul.f32 -1.442695, %v1752_v36 }
 0x343   :  { %2602 = vpow2.f32 %v2024_v24 }
 0x344   :  { %2604 = vpow2.f32 %v2025_v37 }
 0x34d   :  { %v2603_v39 = vpop.eup %2602 }
 0x34e   :  { %v2605_v40 = vpop.eup %2604  ;;  %v1768_v59 = vadd.f32 1.0, %v2603_v39 }
 0x34f   :  { %v1769_v41 = vadd.f32 1.0, %v2605_v40 }
 0x350   :  { %2606 = vrcp.f32 %v1768_v59 }
 0x351   :  { %2608 = vrcp.f32 %v1769_v41 }
 0x35a   :  { %v2607_v48 = vpop.eup %2606 }
 0x35b   :  { %v2609_v49 = vpop.eup %2608 }
 0x35c   :  { %v1783_v35 = vcombine.low %v2607_v48, %v2609_v49 }
 0x35e   :  { %v1797_v53 = vrot.slane %v1783_v35, %v1789_v47 }
 0x360   :  { %v1798_v54 = vcombine.low %v1790_v51, %v1797_v53 }
 0x362   :  { %v1805_v2 = vrot.slane %v1798_v54, %v1789_v47 }
 0x364   :  { %1811 = vst.msk [vmem:[#allocation3] sm:$0xf] %vm1809_vm2, %v1805_v2 }
 0x365   :  { %2621 = shalt.err (!%p2618_p4)
}
 0x366   :  { %s2622_s17 = scalar_lea.hbm %s3336_s7, 64 }
 0x367   :  { %p2623_p5 = scmp.ne.s32.totalorder %s3336_s7, %s2622_s17  ;;  %p2626_p6 = scmp.lt.u32.totalorder %s2622_s17, %s3336_s7 }
 0x369   :  { %p2628_p7 = pnand %p2626_p6, %p2623_p5 }
 0x36b   :  { %2631 = shalt.err (!%p2628_p7)
}
 0x36c   :  { %1821 = dma.vmem_to_hbm [thread:$0]  %s1819_s13, 64, %s3336_s7, [#allocation4]  }
 0x36d   :  { %2632 = dma.done.wait [#allocation4], 64  }
 0x36e   :  { %2633 = vsyncadd [#allocation4], 4294967232 }
 0x36f   :  { %1825 = vsyncpa [#allocation4], 1 }

</bundles_post_ra>
